<compile_context>
chip_gen: v7x
topology: tpu7x:2x2x1
jax: 0.10.0
libtpu: 0.0.40
codegen_flags: <defaults>
</compile_context>

<pallas_src>
import numpy as np
import jax
import jax.numpy as jnp
from jax import lax
from jax.experimental import pallas as pl
from jax.experimental.pallas import tpu as pltpu


def make_lstm_kernel(S, B_pad, D, H):
    def lstm_kernel(x_ref, wih_ref, whh_ref, b_ref,
                    out_ref, hN_ref, cN_ref, gx_ref):
        # ---- hoisted input projection: one matmul for all timesteps --------
        # x_ref: (S*B_pad, D)  wih_ref: (D, 4H)  b_ref: (1, 4H)
        gates_x = (jnp.dot(x_ref[...], wih_ref[...],
                           preferred_element_type=jnp.float32)
                   + b_ref[...])                                   # (S*B_pad, 4H)
        # Tile-aligned split (B_pad=8 sublanes, 4H=128 lanes per step).
        gx_ref[...] = gates_x.reshape(S, B_pad, 4 * H)

        whh = whh_ref[...]                                         # (H, 4H)

        def gate_step(gates, c_prev):
            # sigmoid over the full lane-dense (B_pad, 4H) vreg (EUP),
            # tanh only on the g chunk; slices of the computed value are cheap.
            sig = jax.nn.sigmoid(gates)
            i_g = sig[:, 0 * H:1 * H]
            f_g = sig[:, 1 * H:2 * H]
            o_g = sig[:, 3 * H:4 * H]
            g_g = jnp.tanh(gates[:, 2 * H:3 * H])
            c = f_g * c_prev + i_g * g_g
            h = o_g * jnp.tanh(c)
            return h, c

        # ---- recurrence: S is small & static -> fully unrolled --------------
        # t = 0: h0 == 0, so the recurrent matmul is skipped entirely.
        h, c = gate_step(gx_ref[0], jnp.zeros((B_pad, H), jnp.float32))
        hs = [h]
        for t in range(1, S):
            gates = gx_ref[t] + jnp.dot(h, whh,
                                        preferred_element_type=jnp.float32)
            h, c = gate_step(gates, c)
            hs.append(h)

        # Single lane-dense store (8, S*H=256): unmasked vst, off the chain.
        out_ref[...] = jnp.concatenate(hs, axis=1).astype(out_ref.dtype)
        # Final states written exactly once.
        hN_ref[...] = h.astype(hN_ref.dtype)
        cN_ref[...] = c.astype(cN_ref.dtype)

    return lstm_kernel


def lstm_pallas(emb_sbd, w_ih, w_hh, b_ih, b_hh):
    """emb_sbd: (S, B, D) f32.  Weights in PyTorch layout: w_ih (4H, D), w_hh (4H, H).

    Returns (out_bf (B, S, H), h_n (B, H), c_n (B, H))."""
    S, B, D = emb_sbd.shape
    H = w_hh.shape[1]

    # Pad batch to one f32 sublane tile (8) -> every per-step operand is one vreg.
    B_pad = max(8, ((B + 7) // 8) * 8)
    x = emb_sbd
    if B_pad != B:
        x = jnp.pad(x, ((0, 0), (0, B_pad - B), (0, 0)))          # zero-pad batch
    x_flat = x.reshape(S * B_pad, D)                              # seq-major, flat

    wih_t = jnp.asarray(w_ih, jnp.float32).T                      # (D, 4H)
    whh_t = jnp.asarray(w_hh, jnp.float32).T                      # (H, 4H)
    bias = (jnp.asarray(b_ih, jnp.float32)
            + jnp.asarray(b_hh, jnp.float32)).reshape(1, 4 * H)

    vmem = pl.BlockSpec(memory_space=pltpu.MemorySpace.VMEM)

    out_flat, h_n, c_n = pl.pallas_call(
        make_lstm_kernel(S, B_pad, D, H),
        out_shape=(
            jax.ShapeDtypeStruct((B_pad, S * H), jnp.float32),    # hidden sequence
            jax.ShapeDtypeStruct((B_pad, H), jnp.float32),        # h_n
            jax.ShapeDtypeStruct((B_pad, H), jnp.float32),        # c_n
        ),
        in_specs=[vmem, vmem, vmem, vmem],                        # whole arrays in VMEM, once
        out_specs=(vmem, vmem, vmem),
        scratch_shapes=[pltpu.VMEM((S, B_pad, 4 * H), jnp.float32)],
    )(x_flat, wih_t, whh_t, bias)

    # (B_pad, S*H) is already batch_first: reshape + slice, no transpose.
    out_bf = out_flat[:B].reshape(B, S, H)
    return out_bf, h_n[:B], c_n[:B]


def test_lstm_forward(x_ids, emb_table, w_ih, w_hh, b_ih, b_hh):
    """Mirrors test_LSTM.forward: embedding(x) -> nn.LSTM(batch_first=True).
    Returns (output (B,S,H), (h_n (1,B,H), c_n (1,B,H))) like PyTorch."""
    emb = jnp.take(emb_table, x_ids, axis=0)                      # (B, S, D) — glue (gather)
    emb_sbd = jnp.transpose(emb, (1, 0, 2))                       # (S, B, D) seq-major
    out_bf, h_n, c_n = lstm_pallas(emb_sbd, w_ih, w_hh, b_ih, b_hh)
    return out_bf, (h_n[None], c_n[None])


def lstm_reference(x_ids, emb_table, w_ih, w_hh, b_ih, b_hh):
    """Pure-JAX reference matching torch.nn.LSTM semantics (gate order i,f,g,o)."""
    emb = jnp.take(emb_table, x_ids, axis=0)                      # (B, S, D)
    B = emb.shape[0]
    H = w_hh.shape[1]
    b = b_ih + b_hh

    def step(carry, x_t):
        h, c = carry
        gates = x_t @ w_ih.T + h @ w_hh.T + b
        i = jax.nn.sigmoid(gates[:, 0 * H:1 * H])
        f = jax.nn.sigmoid(gates[:, 1 * H:2 * H])
        g = jnp.tanh(gates[:, 2 * H:3 * H])
        o = jax.nn.sigmoid(gates[:, 3 * H:4 * H])
        c = f * c + i * g
        h = o * jnp.tanh(c)
        return (h, c), h

    h0 = jnp.zeros((B, H), jnp.float32)
    c0 = jnp.zeros((B, H), jnp.float32)
    (h_n, c_n), ys = lax.scan(step, (h0, c0), jnp.transpose(emb, (1, 0, 2)))
    return jnp.transpose(ys, (1, 0, 2)), (h_n[None], c_n[None])


if __name__ == "__main__":
    # Small shapes consistent with the module:
    #   embedding: num_embeddings=num_chords=100, embedding_dim=in_dim=16
    #   LSTM: input=16, hidden=out_dim=32, 1 layer, batch_first
    B, S, VOCAB, D, H = 2, 8, 100, 16, 32

    key = jax.random.PRNGKey(0)
    k_emb, k_wih, k_whh, k_bih, k_bhh, k_x = jax.random.split(key, 6)

    emb_table = jax.random.normal(k_emb, (VOCAB, D), jnp.float32) * 0.1
    bound = 1.0 / np.sqrt(H)
    w_ih = jax.random.uniform(k_wih, (4 * H, D), jnp.float32, -bound, bound)
    w_hh = jax.random.uniform(k_whh, (4 * H, H), jnp.float32, -bound, bound)
    b_ih = jax.random.uniform(k_bih, (4 * H,), jnp.float32, -bound, bound)
    b_hh = jax.random.uniform(k_bhh, (4 * H,), jnp.float32, -bound, bound)

    x_ids = jax.random.randint(k_x, (B, S), 0, VOCAB, jnp.int32)

    out, (h_n, c_n) = test_lstm_forward(x_ids, emb_table, w_ih, w_hh, b_ih, b_hh)
    jax.block_until_ready(out)
    jax.block_until_ready(h_n)
    jax.block_until_ready(c_n)

    ref_out, (ref_h, ref_c) = lstm_reference(x_ids, emb_table, w_ih, w_hh, b_ih, b_hh)
    assert out.shape == (B, S, H) and h_n.shape == (1, B, H) and c_n.shape == (1, B, H)
    np.testing.assert_allclose(np.asarray(out), np.asarray(ref_out), rtol=1e-5, atol=1e-5)
    np.testing.assert_allclose(np.asarray(h_n), np.asarray(ref_h), rtol=1e-5, atol=1e-5)
    np.testing.assert_allclose(np.asarray(c_n), np.asarray(ref_c), rtol=1e-5, atol=1e-5)

    print("KERNEL_OK")
</pallas_src>

<mosaic_0001>
module attributes {stable_mosaic.version = 11 : i64} {
  func.func @lstm_kernel(%arg0: memref<64x16xf32, #tpu.memory_space<vmem>>, %arg1: memref<16x128xf32, #tpu.memory_space<vmem>>, %arg2: memref<32x128xf32, #tpu.memory_space<vmem>>, %arg3: memref<1x128xf32, #tpu.memory_space<vmem>>, %arg4: memref<8x256xf32, #tpu.memory_space<vmem>>, %arg5: memref<8x32xf32, #tpu.memory_space<vmem>>, %arg6: memref<8x32xf32, #tpu.memory_space<vmem>>, %arg7: memref<8x8x128xf32, #tpu.memory_space<vmem>>) attributes {dimension_semantics = [], scalar_prefetch = 0 : i64, scratch_operands = 1 : i64, tpu.core_type = #tpu.core_type<tc>} {
    %c0 = arith.constant 0 : index
    %c0_0 = arith.constant 0 : index
    %0 = vector.load %arg0[%c0, %c0_0] : memref<64x16xf32, #tpu.memory_space<vmem>>, vector<64x16xf32>
    %c0_1 = arith.constant 0 : index
    %c0_2 = arith.constant 0 : index
    %1 = vector.load %arg1[%c0_1, %c0_2] : memref<16x128xf32, #tpu.memory_space<vmem>>, vector<16x128xf32>
    %cst = arith.constant dense<0.000000e+00> : vector<64x128xf32>
    %2 = tpu.matmul %0, %1, %cst {dimension_numbers = #tpu.dot_dimension_numbers<[1], [0], [0], [1], [0, 0, 1, 1], [], []>} : vector<64x16xf32>, vector<16x128xf32>, vector<64x128xf32> -> vector<64x128xf32>
    %c0_3 = arith.constant 0 : index
    %c0_4 = arith.constant 0 : index
    %3 = vector.load %arg3[%c0_3, %c0_4] : memref<1x128xf32, #tpu.memory_space<vmem>>, vector<1x128xf32>
    %4 = vector.broadcast %3 : vector<1x128xf32> to vector<64x128xf32>
    %5 = arith.addf %2, %4 : vector<64x128xf32>
    %6 = vector.shape_cast %5 : vector<64x128xf32> to vector<8x8x128xf32>
    %c0_5 = arith.constant 0 : index
    %c0_6 = arith.constant 0 : index
    %c0_7 = arith.constant 0 : index
    %7 = vector.load %arg7[%c0_5, %c0_6, %c0_7] : memref<8x8x128xf32, #tpu.memory_space<vmem>>, vector<8x8x128xf32>
    tpu.vector_store %arg7[%c0_5, %c0_6, %c0_7], %6 {strides = array<i32>} : memref<8x8x128xf32, #tpu.memory_space<vmem>>, vector<8x8x128xf32>,
    %c0_8 = arith.constant 0 : index
    %c0_9 = arith.constant 0 : index
    %8 = vector.load %arg2[%c0_8, %c0_9] : memref<32x128xf32, #tpu.memory_space<vmem>>, vector<32x128xf32>
    %c0_10 = arith.constant 0 : index
    %c0_11 = arith.constant 0 : index
    %c0_12 = arith.constant 0 : index
    %9 = vector.load %arg7[%c0_10, %c0_11, %c0_12] : memref<8x8x128xf32, #tpu.memory_space<vmem>>, vector<1x8x128xf32>
    %10 = vector.shape_cast %9 : vector<1x8x128xf32> to vector<8x128xf32>
    %cst_13 = arith.constant 0.000000e+00 : f32
    %11 = vector.broadcast %cst_13 : f32 to vector<8x32xf32>
    %12 = arith.negf %10 : vector<8x128xf32>
    %13 = math.exp %12 : vector<8x128xf32>
    %cst_14 = arith.constant 1.000000e+00 : f32
    %14 = vector.broadcast %cst_14 : f32 to vector<8x128xf32>
    %15 = arith.addf %14, %13 : vector<8x128xf32>
    %16 = arith.divf %14, %15 : vector<8x128xf32>
    %17 = vector.extract_strided_slice %16 {offsets = [0, 0], sizes = [8, 32], strides = [1, 1]} : vector<8x128xf32> to vector<8x32xf32>
    %18 = vector.extract_strided_slice %16 {offsets = [0, 32], sizes = [8, 32], strides = [1, 1]} : vector<8x128xf32> to vector<8x32xf32>
    %19 = vector.extract_strided_slice %16 {offsets = [0, 96], sizes = [8, 32], strides = [1, 1]} : vector<8x128xf32> to vector<8x32xf32>
    %20 = vector.extract_strided_slice %10 {offsets = [0, 64], sizes = [8, 32], strides = [1, 1]} : vector<8x128xf32> to vector<8x32xf32>
    %21 = math.tanh %20 : vector<8x32xf32>
    %22 = arith.mulf %18, %11 : vector<8x32xf32>
    %23 = arith.mulf %17, %21 : vector<8x32xf32>
    %24 = arith.addf %22, %23 : vector<8x32xf32>
    %25 = math.tanh %24 : vector<8x32xf32>
    %26 = arith.mulf %19, %25 : vector<8x32xf32>
    %c1 = arith.constant 1 : index
    %c0_15 = arith.constant 0 : index
    %c0_16 = arith.constant 0 : index
    %27 = vector.load %arg7[%c1, %c0_15, %c0_16] : memref<8x8x128xf32, #tpu.memory_space<vmem>>, vector<1x8x128xf32>
    %28 = vector.shape_cast %27 : vector<1x8x128xf32> to vector<8x128xf32>
    %cst_17 = arith.constant dense<0.000000e+00> : vector<8x128xf32>
    %29 = tpu.matmul %26, %8, %cst_17 {dimension_numbers = #tpu.dot_dimension_numbers<[1], [0], [0], [1], [0, 0, 1, 1], [], []>} : vector<8x32xf32>, vector<32x128xf32>, vector<8x128xf32> -> vector<8x128xf32>
    %30 = arith.addf %28, %29 : vector<8x128xf32>
    %31 = arith.negf %30 : vector<8x128xf32>
    %32 = math.exp %31 : vector<8x128xf32>
    %cst_18 = arith.constant 1.000000e+00 : f32
    %33 = vector.broadcast %cst_18 : f32 to vector<8x128xf32>
    %34 = arith.addf %33, %32 : vector<8x128xf32>
    %35 = arith.divf %33, %34 : vector<8x128xf32>
    %36 = vector.extract_strided_slice %35 {offsets = [0, 0], sizes = [8, 32], strides = [1, 1]} : vector<8x128xf32> to vector<8x32xf32>
    %37 = vector.extract_strided_slice %35 {offsets = [0, 32], sizes = [8, 32], strides = [1, 1]} : vector<8x128xf32> to vector<8x32xf32>
    %38 = vector.extract_strided_slice %35 {offsets = [0, 96], sizes = [8, 32], strides = [1, 1]} : vector<8x128xf32> to vector<8x32xf32>
    %39 = vector.extract_strided_slice %30 {offsets = [0, 64], sizes = [8, 32], strides = [1, 1]} : vector<8x128xf32> to vector<8x32xf32>
    %40 = math.tanh %39 : vector<8x32xf32>
    %41 = arith.mulf %37, %24 : vector<8x32xf32>
    %42 = arith.mulf %36, %40 : vector<8x32xf32>
    %43 = arith.addf %41, %42 : vector<8x32xf32>
    %44 = math.tanh %43 : vector<8x32xf32>
    %45 = arith.mulf %38, %44 : vector<8x32xf32>
    %c2 = arith.constant 2 : index
    %c0_19 = arith.constant 0 : index
    %c0_20 = arith.constant 0 : index
    %46 = vector.load %arg7[%c2, %c0_19, %c0_20] : memref<8x8x128xf32, #tpu.memory_space<vmem>>, vector<1x8x128xf32>
    %47 = vector.shape_cast %46 : vector<1x8x128xf32> to vector<8x128xf32>
    %cst_21 = arith.constant dense<0.000000e+00> : vector<8x128xf32>
    %48 = tpu.matmul %45, %8, %cst_21 {dimension_numbers = #tpu.dot_dimension_numbers<[1], [0], [0], [1], [0, 0, 1, 1], [], []>} : vector<8x32xf32>, vector<32x128xf32>, vector<8x128xf32> -> vector<8x128xf32>
    %49 = arith.addf %47, %48 : vector<8x128xf32>
    %50 = arith.negf %49 : vector<8x128xf32>
    %51 = math.exp %50 : vector<8x128xf32>
    %cst_22 = arith.constant 1.000000e+00 : f32
    %52 = vector.broadcast %cst_22 : f32 to vector<8x128xf32>
    %53 = arith.addf %52, %51 : vector<8x128xf32>
    %54 = arith.divf %52, %53 : vector<8x128xf32>
    %55 = vector.extract_strided_slice %54 {offsets = [0, 0], sizes = [8, 32], strides = [1, 1]} : vector<8x128xf32> to vector<8x32xf32>
    %56 = vector.extract_strided_slice %54 {offsets = [0, 32], sizes = [8, 32], strides = [1, 1]} : vector<8x128xf32> to vector<8x32xf32>
    %57 = vector.extract_strided_slice %54 {offsets = [0, 96], sizes = [8, 32], strides = [1, 1]} : vector<8x128xf32> to vector<8x32xf32>
    %58 = vector.extract_strided_slice %49 {offsets = [0, 64], sizes = [8, 32], strides = [1, 1]} : vector<8x128xf32> to vector<8x32xf32>
    %59 = math.tanh %58 : vector<8x32xf32>
    %60 = arith.mulf %56, %43 : vector<8x32xf32>
    %61 = arith.mulf %55, %59 : vector<8x32xf32>
    %62 = arith.addf %60, %61 : vector<8x32xf32>
    %63 = math.tanh %62 : vector<8x32xf32>
    %64 = arith.mulf %57, %63 : vector<8x32xf32>
    %c3 = arith.constant 3 : index
    %c0_23 = arith.constant 0 : index
    %c0_24 = arith.constant 0 : index
    %65 = vector.load %arg7[%c3, %c0_23, %c0_24] : memref<8x8x128xf32, #tpu.memory_space<vmem>>, vector<1x8x128xf32>
    %66 = vector.shape_cast %65 : vector<1x8x128xf32> to vector<8x128xf32>
    %cst_25 = arith.constant dense<0.000000e+00> : vector<8x128xf32>
    %67 = tpu.matmul %64, %8, %cst_25 {dimension_numbers = #tpu.dot_dimension_numbers<[1], [0], [0], [1], [0, 0, 1, 1], [], []>} : vector<8x32xf32>, vector<32x128xf32>, vector<8x128xf32> -> vector<8x128xf32>
    %68 = arith.addf %66, %67 : vector<8x128xf32>
    %69 = arith.negf %68 : vector<8x128xf32>
    %70 = math.exp %69 : vector<8x128xf32>
    %cst_26 = arith.constant 1.000000e+00 : f32
    %71 = vector.broadcast %cst_26 : f32 to vector<8x128xf32>
    %72 = arith.addf %71, %70 : vector<8x128xf32>
    %73 = arith.divf %71, %72 : vector<8x128xf32>
    %74 = vector.extract_strided_slice %73 {offsets = [0, 0], sizes = [8, 32], strides = [1, 1]} : vector<8x128xf32> to vector<8x32xf32>
    %75 = vector.extract_strided_slice %73 {offsets = [0, 32], sizes = [8, 32], strides = [1, 1]} : vector<8x128xf32> to vector<8x32xf32>
    %76 = vector.extract_strided_slice %73 {offsets = [0, 96], sizes = [8, 32], strides = [1, 1]} : vector<8x128xf32> to vector<8x32xf32>
    %77 = vector.extract_strided_slice %68 {offsets = [0, 64], sizes = [8, 32], strides = [1, 1]} : vector<8x128xf32> to vector<8x32xf32>
    %78 = math.tanh %77 : vector<8x32xf32>
    %79 = arith.mulf %75, %62 : vector<8x32xf32>
    %80 = arith.mulf %74, %78 : vector<8x32xf32>
    %81 = arith.addf %79, %80 : vector<8x32xf32>
    %82 = math.tanh %81 : vector<8x32xf32>
    %83 = arith.mulf %76, %82 : vector<8x32xf32>
    %c4 = arith.constant 4 : index
    %c0_27 = arith.constant 0 : index
    %c0_28 = arith.constant 0 : index
    %84 = vector.load %arg7[%c4, %c0_27, %c0_28] : memref<8x8x128xf32, #tpu.memory_space<vmem>>, vector<1x8x128xf32>
    %85 = vector.shape_cast %84 : vector<1x8x128xf32> to vector<8x128xf32>
    %cst_29 = arith.constant dense<0.000000e+00> : vector<8x128xf32>
    %86 = tpu.matmul %83, %8, %cst_29 {dimension_numbers = #tpu.dot_dimension_numbers<[1], [0], [0], [1], [0, 0, 1, 1], [], []>} : vector<8x32xf32>, vector<32x128xf32>, vector<8x128xf32> -> vector<8x128xf32>
    %87 = arith.addf %85, %86 : vector<8x128xf32>
    %88 = arith.negf %87 : vector<8x128xf32>
    %89 = math.exp %88 : vector<8x128xf32>
    %cst_30 = arith.constant 1.000000e+00 : f32
    %90 = vector.broadcast %cst_30 : f32 to vector<8x128xf32>
    %91 = arith.addf %90, %89 : vector<8x128xf32>
    %92 = arith.divf %90, %91 : vector<8x128xf32>
    %93 = vector.extract_strided_slice %92 {offsets = [0, 0], sizes = [8, 32], strides = [1, 1]} : vector<8x128xf32> to vector<8x32xf32>
    %94 = vector.extract_strided_slice %92 {offsets = [0, 32], sizes = [8, 32], strides = [1, 1]} : vector<8x128xf32> to vector<8x32xf32>
    %95 = vector.extract_strided_slice %92 {offsets = [0, 96], sizes = [8, 32], strides = [1, 1]} : vector<8x128xf32> to vector<8x32xf32>
    %96 = vector.extract_strided_slice %87 {offsets = [0, 64], sizes = [8, 32], strides = [1, 1]} : vector<8x128xf32> to vector<8x32xf32>
    %97 = math.tanh %96 : vector<8x32xf32>
    %98 = arith.mulf %94, %81 : vector<8x32xf32>
    %99 = arith.mulf %93, %97 : vector<8x32xf32>
    %100 = arith.addf %98, %99 : vector<8x32xf32>
    %101 = math.tanh %100 : vector<8x32xf32>
    %102 = arith.mulf %95, %101 : vector<8x32xf32>
    %c5 = arith.constant 5 : index
    %c0_31 = arith.constant 0 : index
    %c0_32 = arith.constant 0 : index
    %103 = vector.load %arg7[%c5, %c0_31, %c0_32] : memref<8x8x128xf32, #tpu.memory_space<vmem>>, vector<1x8x128xf32>
    %104 = vector.shape_cast %103 : vector<1x8x128xf32> to vector<8x128xf32>
    %cst_33 = arith.constant dense<0.000000e+00> : vector<8x128xf32>
    %105 = tpu.matmul %102, %8, %cst_33 {dimension_numbers = #tpu.dot_dimension_numbers<[1], [0], [0], [1], [0, 0, 1, 1], [], []>} : vector<8x32xf32>, vector<32x128xf32>, vector<8x128xf32> -> vector<8x128xf32>
    %106 = arith.addf %104, %105 : vector<8x128xf32>
    %107 = arith.negf %106 : vector<8x128xf32>
    %108 = math.exp %107 : vector<8x128xf32>
    %cst_34 = arith.constant 1.000000e+00 : f32
    %109 = vector.broadcast %cst_34 : f32 to vector<8x128xf32>
    %110 = arith.addf %109, %108 : vector<8x128xf32>
    %111 = arith.divf %109, %110 : vector<8x128xf32>
    %112 = vector.extract_strided_slice %111 {offsets = [0, 0], sizes = [8, 32], strides = [1, 1]} : vector<8x128xf32> to vector<8x32xf32>
    %113 = vector.extract_strided_slice %111 {offsets = [0, 32], sizes = [8, 32], strides = [1, 1]} : vector<8x128xf32> to vector<8x32xf32>
    %114 = vector.extract_strided_slice %111 {offsets = [0, 96], sizes = [8, 32], strides = [1, 1]} : vector<8x128xf32> to vector<8x32xf32>
    %115 = vector.extract_strided_slice %106 {offsets = [0, 64], sizes = [8, 32], strides = [1, 1]} : vector<8x128xf32> to vector<8x32xf32>
    %116 = math.tanh %115 : vector<8x32xf32>
    %117 = arith.mulf %113, %100 : vector<8x32xf32>
    %118 = arith.mulf %112, %116 : vector<8x32xf32>
    %119 = arith.addf %117, %118 : vector<8x32xf32>
    %120 = math.tanh %119 : vector<8x32xf32>
    %121 = arith.mulf %114, %120 : vector<8x32xf32>
    %c6 = arith.constant 6 : index
    %c0_35 = arith.constant 0 : index
    %c0_36 = arith.constant 0 : index
    %122 = vector.load %arg7[%c6, %c0_35, %c0_36] : memref<8x8x128xf32, #tpu.memory_space<vmem>>, vector<1x8x128xf32>
    %123 = vector.shape_cast %122 : vector<1x8x128xf32> to vector<8x128xf32>
    %cst_37 = arith.constant dense<0.000000e+00> : vector<8x128xf32>
    %124 = tpu.matmul %121, %8, %cst_37 {dimension_numbers = #tpu.dot_dimension_numbers<[1], [0], [0], [1], [0, 0, 1, 1], [], []>} : vector<8x32xf32>, vector<32x128xf32>, vector<8x128xf32> -> vector<8x128xf32>
    %125 = arith.addf %123, %124 : vector<8x128xf32>
    %126 = arith.negf %125 : vector<8x128xf32>
    %127 = math.exp %126 : vector<8x128xf32>
    %cst_38 = arith.constant 1.000000e+00 : f32
    %128 = vector.broadcast %cst_38 : f32 to vector<8x128xf32>
    %129 = arith.addf %128, %127 : vector<8x128xf32>
    %130 = arith.divf %128, %129 : vector<8x128xf32>
    %131 = vector.extract_strided_slice %130 {offsets = [0, 0], sizes = [8, 32], strides = [1, 1]} : vector<8x128xf32> to vector<8x32xf32>
    %132 = vector.extract_strided_slice %130 {offsets = [0, 32], sizes = [8, 32], strides = [1, 1]} : vector<8x128xf32> to vector<8x32xf32>
    %133 = vector.extract_strided_slice %130 {offsets = [0, 96], sizes = [8, 32], strides = [1, 1]} : vector<8x128xf32> to vector<8x32xf32>
    %134 = vector.extract_strided_slice %125 {offsets = [0, 64], sizes = [8, 32], strides = [1, 1]} : vector<8x128xf32> to vector<8x32xf32>
    %135 = math.tanh %134 : vector<8x32xf32>
    %136 = arith.mulf %132, %119 : vector<8x32xf32>
    %137 = arith.mulf %131, %135 : vector<8x32xf32>
    %138 = arith.addf %136, %137 : vector<8x32xf32>
    %139 = math.tanh %138 : vector<8x32xf32>
    %140 = arith.mulf %133, %139 : vector<8x32xf32>
    %c7 = arith.constant 7 : index
    %c0_39 = arith.constant 0 : index
    %c0_40 = arith.constant 0 : index
    %141 = vector.load %arg7[%c7, %c0_39, %c0_40] : memref<8x8x128xf32, #tpu.memory_space<vmem>>, vector<1x8x128xf32>
    %142 = vector.shape_cast %141 : vector<1x8x128xf32> to vector<8x128xf32>
    %cst_41 = arith.constant dense<0.000000e+00> : vector<8x128xf32>
    %143 = tpu.matmul %140, %8, %cst_41 {dimension_numbers = #tpu.dot_dimension_numbers<[1], [0], [0], [1], [0, 0, 1, 1], [], []>} : vector<8x32xf32>, vector<32x128xf32>, vector<8x128xf32> -> vector<8x128xf32>
    %144 = arith.addf %142, %143 : vector<8x128xf32>
    %145 = arith.negf %144 : vector<8x128xf32>
    %146 = math.exp %145 : vector<8x128xf32>
    %cst_42 = arith.constant 1.000000e+00 : f32
    %147 = vector.broadcast %cst_42 : f32 to vector<8x128xf32>
    %148 = arith.addf %147, %146 : vector<8x128xf32>
    %149 = arith.divf %147, %148 : vector<8x128xf32>
    %150 = vector.extract_strided_slice %149 {offsets = [0, 0], sizes = [8, 32], strides = [1, 1]} : vector<8x128xf32> to vector<8x32xf32>
    %151 = vector.extract_strided_slice %149 {offsets = [0, 32], sizes = [8, 32], strides = [1, 1]} : vector<8x128xf32> to vector<8x32xf32>
    %152 = vector.extract_strided_slice %149 {offsets = [0, 96], sizes = [8, 32], strides = [1, 1]} : vector<8x128xf32> to vector<8x32xf32>
    %153 = vector.extract_strided_slice %144 {offsets = [0, 64], sizes = [8, 32], strides = [1, 1]} : vector<8x128xf32> to vector<8x32xf32>
    %154 = math.tanh %153 : vector<8x32xf32>
    %155 = arith.mulf %151, %138 : vector<8x32xf32>
    %156 = arith.mulf %150, %154 : vector<8x32xf32>
    %157 = arith.addf %155, %156 : vector<8x32xf32>
    %158 = math.tanh %157 : vector<8x32xf32>
    %159 = arith.mulf %152, %158 : vector<8x32xf32>
    %160 = tpu.concatenate %26, %45, %64, %83, %102, %121, %140, %159 in 1 : vector<8x32xf32>, vector<8x32xf32>, vector<8x32xf32>, vector<8x32xf32>, vector<8x32xf32>, vector<8x32xf32>, vector<8x32xf32>, vector<8x32xf32> -> vector<8x256xf32>
    %c0_43 = arith.constant 0 : index
    %c0_44 = arith.constant 0 : index
    %161 = vector.load %arg4[%c0_43, %c0_44] : memref<8x256xf32, #tpu.memory_space<vmem>>, vector<8x256xf32>
    tpu.vector_store %arg4[%c0_43, %c0_44], %160 {strides = array<i32>} : memref<8x256xf32, #tpu.memory_space<vmem>>, vector<8x256xf32>,
    %c0_45 = arith.constant 0 : index
    %c0_46 = arith.constant 0 : index
    %162 = vector.load %arg5[%c0_45, %c0_46] : memref<8x32xf32, #tpu.memory_space<vmem>>, vector<8x32xf32>
    tpu.vector_store %arg5[%c0_45, %c0_46], %159 {strides = array<i32>} : memref<8x32xf32, #tpu.memory_space<vmem>>, vector<8x32xf32>,
    %c0_47 = arith.constant 0 : index
    %c0_48 = arith.constant 0 : index
    %163 = vector.load %arg6[%c0_47, %c0_48] : memref<8x32xf32, #tpu.memory_space<vmem>>, vector<8x32xf32>
    tpu.vector_store %arg6[%c0_47, %c0_48], %157 {strides = array<i32>} : memref<8x32xf32, #tpu.memory_space<vmem>>, vector<8x32xf32>,
    return
  }
}

</mosaic_0001>

<bundles_post_ra>
// kernel: tpu_custom_call.1
= control target key start
LH: loop header
LB: loop body
LE: loop exit
PB: predicated region body
PF: predicated region fallthrough
CT: control target
= control target key end

     0   :  { %12 = vsyncpa [#allocation4], 0  ;;  %vm39_vm0 = vcmask 130048   ;;  %s1618_s0 = inlined_call_operand.vmem [shape: f32[64,16], index: 0, kind: input, shape index: {}]   ;;  %s1619_s1 = inlined_call_operand.vmem [shape: f32[16,128], index: 1, kind: input, shape index: {}]   ;;  %s1620_s2 = inlined_call_operand.vmem [shape: f32[32,128], index: 2, kind: input, shape index: {}]   ;;  %s1621_s3 = inlined_call_operand.vmem [shape: f32[1,128], index: 3, kind: input, shape index: {}]   ;;  %s1622_s4 = inlined_call_operand.hbm [shape: f32[8,256], index: 4, kind: output, shape index: {0}]   ;;  %s1623_s5 = inlined_call_operand.hbm [shape: f32[8,32], index: 5, kind: output, shape index: {1}]   ;;  %s1624_s6 = inlined_call_operand.hbm [shape: f32[8,32], index: 6, kind: output, shape index: {2}]  }
   0x1   :  { %v30_v0 = vld [vmem:[%s1619_s1] sm:$0xff]  ;;  %v31_v1 = vld [vmem:[%s1619_s1 + $0x8] sm:$0xff] }
   0x2   :  { %v22_v2 = vld [vmem:[%s1618_s0] sm:$0xff]  ;;  %v1158_v3 = vpack.c.bf16 %v31_v1, %v30_v0 }
   0x3   :  { %1069 = vmatprep.mubr.msk.f32.mxu0 %vm39_vm0, %v22_v2 }
   0x4   :  { %13 = vsyncpa [#allocation6], 0  ;;  %1159 = vmatprep.subr.bf16.mxu0 %v1158_v3  ;;  %v23_v4 = vld [vmem:[%s1618_s0 + $0x8] sm:$0xff]  ;;  %v1408_v5 = vld [vmem:[%s1621_s3] ss:$0 sm:$0xff]  ;;  %s1347_s1 = smov 64  }
   0x5   :  { %1161 = vmatpush3.bf16.msra.mxu0 %v1158_v3  ;;  %s1348_s7 = smov 32   ;;  %v177_v19 = vld [vmem:[%s1620_s2] sm:$0xff]  ;;  %v178_v20 = vld [vmem:[%s1620_s2 + $0x8] sm:$0xff]  ;;  %v179_v21 = vld [vmem:[%s1620_s2 + $0x10] sm:$0xff]  ;;  %v1349_v22 = vmov 0.0|0.0   ;;  %vm1350_vm1 = vmmov 0  }
   0x6   :  { %1162 = vmatprep.subr.bf16.mxu1 %v1349_v22  ;;  %v1423_v23 = vpack.c.bf16 %v178_v20, %v177_v19  ;;  %v180_v24 = vld [vmem:[%s1620_s2 + $0x18] sm:$0xff]  ;;  %v1351_v25 = vmov 0.0   ;;  %1174 = vmatprep.subr.bf16.mxu0 %v1349_v22  ;;  %vm211_vm2 = vcmask 261120   ;;  %v24_v45 = vld [vmem:[%s1618_s0 + $0x10] sm:$0xff]  ;;  %v26_v3 = vld [vmem:[%s1618_s0 + $0x20] sm:$0xff]  ;;  %vm936_vm3 = vcmask 523264  }
   0x7   :  { %1089 = vmatprep.mubr.msk.f32.mxu1 %vm1350_vm1, %v1351_v25  ;;  %v1432_v26 = vpack.c.bf16 %v180_v24, %v179_v21  ;;  %v25_v46 = vld [vmem:[%s1618_s0 + $0x18] sm:$0xff]  ;;  %vm938_vm4 = vcmask 785408   ;;  %s1353_s26 = smov [#allocation3]  }
   0x8   :  { %1070 = vmatmul.mubr.msk.f32.vlgmr.msra.gmra.mrb[0].mxu0 %vm39_vm0, %v23_v4  ;;  %1164 = vmatpush3.bf16.msra.mxu1 %v1423_v23  ;;  %v27_v4 = vld [vmem:[%s1618_s0 + $0x28] sm:$0xff]  ;;  %s961_s27 = sshll.u32 %s1353_s26, 4  ;;  %s962_s27 = int_to_ptr.vmem [resolvable:$true] %s961_s27 }
   0x9   :  { %1176 = vmatpush3.bf16.msra.mxu0 %v1423_v23  ;;  %1165 = vmatprep.subr.bf16.mxu1 %v1349_v22  ;;  %s1277_s28 = scalar_lea.vmem %s962_s27, 256  ;;  %p1282_p1 = scmp.lt.s32.totalorder %s962_s27, %s962_s27 }
   0xa   :  { %1177 = vmatprep.subr.bf16.mxu0 %v1349_v22  ;;  %1072 = vmatprep.mubr.msk.f32.mxu0 %vm39_vm0, %v24_v45  ;;  %p1278_p0 = scmp.ne.s32.totalorder %s962_s27, %s1277_s28  ;;  %p1283_p2 = scmp.lt.s32.totalorder %s1277_s28, %s1277_s28 }
   0xc   :  { %1167 = vmatpush3.bf16.msra.mxu1 %v1432_v26  ;;  %1073 = vmatmul.mubr.msk.f32.gmra.mrb[2].mxu0 %vm39_vm0, %v25_v46  ;;  %p1284_p3 = por %p1283_p2, %p1282_p1 }
   0xd   :  { %1179 = vmatpush3.bf16.msra.mxu0 %v1432_v26  ;;  %1168 = vmatprep.subr.bf16.mxu1 %v1349_v22 }
   0xe   :  { %1186 = vmatprep.subr.bf16.mxu0 %v1349_v22  ;;  %1075 = vmatprep.mubr.msk.f32.mxu0 %vm39_vm0, %v26_v3  ;;  %p1285_p4 = pnand %p1284_p3, %p1278_p0 }
  0x10   :  { %1076 = vmatmul.mubr.msk.f32.gmra.mrb[4].mxu0 %vm39_vm0, %v27_v4 }
  0xdb   :  { %v1071_v6 = vpop.f32.mrb[0].mxu0 }
  0xdc   :  { %v130_v7 = vpop.f32.mrb[1].mxu0  ;;  %v136_v31 = vadd.f32 %v1071_v6, %v1408_v5  ;;  %v28_v6 = vld [vmem:[%s1618_s0 + $0x30] sm:$0xff] }
  0xdd   :  { %v131_v8 = vadd.f32 %v1408_v5, %v130_v7  ;;  %1078 = vmatprep.mubr.msk.f32.mxu0 %vm39_vm0, %v28_v6  ;;  %v29_v7 = vld [vmem:[%s1618_s0 + $0x38] sm:$0xff]  ;;  %s1352_s0 = smov 96  }
  0xde   :  { %1079 = vmatmul.mubr.msk.f32.gmra.mrb[6].mxu0 %vm39_vm0, %v29_v7 }
  0xdf   :  { %1213 = vtanh.f32 %v131_v8  ;;  %v1005_v10 = vmul.f32 -1.442695, %v131_v8  ;;  %v1074_v50 = vpop.f32.mrb[2].mxu0  ;;  %1111 = vmatprep.mubr.msk.f32.mxu0 %vm1350_vm1, %v1351_v25 }
  0xe0   :  { %v140_v51 = vpop.f32.mrb[3].mxu0 }
  0xe1   :  { %1215 = vpow2.f32 %v1005_v10  ;;  %v141_v53 = vadd.f32 %v1408_v5, %v140_v51 }
  0xe9   :  { %v1214_v9 = vpop.eup %1213 }
  0xea   :  { %191 = vrot.lane.b32.xlu0 %v1214_v9, %s1347_s1 }
  0xeb   :  { %v1216_v11 = vpop.eup %1215 }
  0xec   :  { %v185_v12 = vadd.f32 1.0, %v1216_v11  ;;  %v1502_v11 = vpop.f32.mrb[4].mxu0 }
  0xee   :  { %1217 = vrcp.f32 %v185_v12  ;;  %v150_v12 = vpop.f32.mrb[5].mxu0 }
  0xf8   :  { %v1218_v13 = vpop.eup %1217 }
  0xf9   :  { %v189_v16 = vmul.f32 0.0, %v1218_v13 }
 0x15c   :  { %v192_v14 = vpop.permute.xlu0 %191 }
 0x15d   :  { %v194_v15 = vmul.f32 %v1218_v13, %v192_v14 }
 0x15f   :  { %196 = vrot.lane.b32.xlu0 %v194_v15, %s1348_s7 }
 0x1d1   :  { %v197_v17 = vpop.permute.xlu0 %196 }
 0x1d2   :  { %v199_v18 = vadd.f32 %v197_v17, %v189_v16  ;;  %v146_v16 = vadd.f32 %v1074_v50, %v1408_v5 }
 0x1d4   :  { %1219 = vtanh.f32 %v199_v18 }
 0x1de   :  { %v1220_v27 = vpop.eup %1219 }
 0x1df   :  { %202 = vrot.lane.b32.xlu1 %v1220_v27, %s1347_s1 }
 0x251   :  { %v203_v28 = vpop.permute.xlu1 %202 }
 0x252   :  { %v205_v29 = vmul.f32 %v1218_v13, %v203_v28  ;;  %v1504_v13 = vpop.f32.mrb[6].mxu0 }
 0x253   :  { %v1506_v14 = vpop.f32.mrb[7].mxu0 }
 0x254   :  { %209 = vrot.lane.b32.xlu1 %v205_v29, %s1348_s7 }
 0x2c6   :  { %v1443_v30 = vpop.permute.xlu1 %209 }
 0x2c7   :  { %1090 = vmatmul.mubr.msk.f32.vlgmr.msra.gmra.mrb[0].mxu1 %vm211_vm2, %v1443_v30 }
 0x2c8   :  { %1170 = vmatpush3.bf16.msra.mxu1 %v1423_v23  ;;  %1100 = vmatprep.mubr.msk.f32.mxu1 %vm1350_vm1, %v1351_v25 }
 0x2c9   :  { %1171 = vmatprep.subr.bf16.mxu1 %v1349_v22 }
 0x2cc   :  { %1173 = vmatpush3.bf16.msra.mxu1 %v1432_v26 }
 0x2cd   :  { %1180 = vmatprep.subr.bf16.mxu1 %v1349_v22 }
 0x39a   :  { %v280_v32 = vpop.f32.mrb[0].mxu1 }
 0x39b   :  { %v284_v33 = vadd.f32 %v280_v32, %v136_v31  ;;  %v1091_v34 = vpop.f32.mrb[1].mxu1 }
 0x39d   :  { %1221 = vtanh.f32 %v284_v33  ;;  %v1007_v36 = vmul.f32 -1.442695, %v284_v33 }
 0x39f   :  { %1223 = vpow2.f32 %v1007_v36 }
 0x3a7   :  { %v1222_v35 = vpop.eup %1221 }
 0x3a8   :  { %294 = vrot.lane.b32.xlu0 %v1222_v35, %s1347_s1 }
 0x3a9   :  { %v1224_v37 = vpop.eup %1223 }
 0x3aa   :  { %v288_v38 = vadd.f32 1.0, %v1224_v37 }
 0x3ac   :  { %1225 = vrcp.f32 %v288_v38 }
 0x3b6   :  { %v1226_v39 = vpop.eup %1225 }
 0x3b7   :  { %v292_v42 = vmul.f32 %v1226_v39, %v199_v18 }
 0x41a   :  { %v295_v40 = vpop.permute.xlu0 %294 }
 0x41b   :  { %v297_v41 = vmul.f32 %v1226_v39, %v295_v40 }
 0x41d   :  { %299 = vrot.lane.b32.xlu1 %v297_v41, %s1348_s7 }
 0x48f   :  { %v300_v43 = vpop.permute.xlu1 %299 }
 0x490   :  { %v302_v44 = vadd.f32 %v300_v43, %v292_v42 }
 0x492   :  { %1227 = vtanh.f32 %v302_v44 }
 0x49c   :  { %v1228_v47 = vpop.eup %1227 }
 0x49d   :  { %305 = vrot.lane.b32.xlu0 %v1228_v47, %s1347_s1 }
 0x50f   :  { %v306_v48 = vpop.permute.xlu0 %305 }
 0x510   :  { %v1465_v49 = vmul.f32 %v1226_v39, %v306_v48  ;;  %v151_v39 = vadd.f32 %v1408_v5, %v150_v12 }
 0x512   :  { %312 = vrot.lane.b32.xlu1 %v1465_v49, %s1348_s7 }
 0x584   :  { %v313_v52 = vpop.permute.xlu1 %312 }
 0x585   :  { %1101 = vmatmul.mubr.msk.f32.vlgmr.msra.gmra.mrb[2].mxu1 %vm211_vm2, %v313_v52 }
 0x586   :  { %1182 = vmatpush3.bf16.msra.mxu1 %v1423_v23  ;;  %1122 = vmatprep.mubr.msk.f32.mxu1 %vm1350_vm1, %v1351_v25 }
 0x587   :  { %1183 = vmatprep.subr.bf16.mxu1 %v1349_v22 }
 0x58a   :  { %1185 = vmatpush3.bf16.msra.mxu1 %v1432_v26 }
 0x58b   :  { %1192 = vmatprep.subr.bf16.mxu1 %v1349_v22 }
 0x658   :  { %v382_v54 = vpop.f32.mrb[2].mxu1 }
 0x659   :  { %v386_v55 = vadd.f32 %v382_v54, %v141_v53  ;;  %v1102_v56 = vpop.f32.mrb[3].mxu1 }
 0x65b   :  { %1229 = vtanh.f32 %v386_v55  ;;  %v1009_v58 = vmul.f32 -1.442695, %v386_v55 }
 0x65d   :  { %1231 = vpow2.f32 %v1009_v58  ;;  %v156_v58 = vadd.f32 %v1502_v11, %v1408_v5 }
 0x665   :  { %v1230_v57 = vpop.eup %1229 }
 0x666   :  { %396 = vrot.lane.b32.xlu0 %v1230_v57, %s1347_s1 }
 0x667   :  { %v1232_v59 = vpop.eup %1231 }
 0x668   :  { %v390_v60 = vadd.f32 1.0, %v1232_v59 }
 0x66a   :  { %1233 = vrcp.f32 %v390_v60 }
 0x674   :  { %v1234_v61 = vpop.eup %1233 }
 0x675   :  { %v394_v0 = vmul.f32 %v1234_v61, %v302_v44 }
 0x6d8   :  { %v397_v62 = vpop.permute.xlu0 %396 }
 0x6d9   :  { %v399_v63 = vmul.f32 %v1234_v61, %v397_v62 }
 0x6db   :  { %401 = vrot.lane.b32.xlu1 %v399_v63, %s1348_s7 }
 0x74d   :  { %v402_v1 = vpop.permute.xlu1 %401 }
 0x74e   :  { %v404_v2 = vadd.f32 %v402_v1, %v394_v0 }
 0x750   :  { %1235 = vtanh.f32 %v404_v2 }
 0x75a   :  { %v1236_v8 = vpop.eup %1235 }
 0x75b   :  { %407 = vrot.lane.b32.xlu0 %v1236_v8, %s1347_s1 }
 0x7cd   :  { %v408_v9 = vpop.permute.xlu0 %407 }
 0x7ce   :  { %v1498_v10 = vmul.f32 %v1234_v61, %v408_v9  ;;  %v161_v9 = vadd.f32 %v1408_v5, %v1506_v14 }
 0x7d0   :  { %414 = vrot.lane.b32.xlu1 %v1498_v10, %s1348_s7 }
 0x842   :  { %v415_v15 = vpop.permute.xlu1 %414 }
 0x843   :  { %1112 = vmatmul.mubr.msk.f32.vlgmr.msra.gmra.mrb[8].mxu0 %vm211_vm2, %v415_v15 }
 0x844   :  { %1188 = vmatpush3.bf16.msra.mxu0 %v1423_v23  ;;  %1133 = vmatprep.mubr.msk.f32.mxu0 %vm1350_vm1, %v1351_v25 }
 0x845   :  { %1189 = vmatprep.subr.bf16.mxu0 %v1349_v22 }
 0x848   :  { %1191 = vmatpush3.bf16.msra.mxu0 %v1432_v26 }
 0x849   :  { %1198 = vmatprep.subr.bf16.mxu0 %v1349_v22 }
 0x916   :  { %v484_v17 = vpop.f32.mrb[8].mxu0 }
 0x917   :  { %v488_v18 = vadd.f32 %v484_v17, %v146_v16  ;;  %v1113_v19 = vpop.f32.mrb[9].mxu0 }
 0x919   :  { %1237 = vtanh.f32 %v488_v18  ;;  %v1011_v21 = vmul.f32 -1.442695, %v488_v18 }
 0x91b   :  { %1239 = vpow2.f32 %v1011_v21 }
 0x923   :  { %v1238_v20 = vpop.eup %1237 }
 0x924   :  { %498 = vrot.lane.b32.xlu0 %v1238_v20, %s1347_s1 }
 0x925   :  { %v1240_v24 = vpop.eup %1239 }
 0x926   :  { %v492_v27 = vadd.f32 1.0, %v1240_v24 }
 0x928   :  { %1241 = vrcp.f32 %v492_v27 }
 0x932   :  { %v1242_v28 = vpop.eup %1241 }
 0x933   :  { %v496_v32 = vmul.f32 %v1242_v28, %v404_v2 }
 0x996   :  { %v499_v29 = vpop.permute.xlu0 %498 }
 0x997   :  { %v501_v31 = vmul.f32 %v1242_v28, %v499_v29 }
 0x999   :  { %503 = vrot.lane.b32.xlu1 %v501_v31, %s1348_s7 }
 0xa0b   :  { %v504_v33 = vpop.permute.xlu1 %503 }
 0xa0c   :  { %v506_v34 = vadd.f32 %v504_v33, %v496_v32 }
 0xa0e   :  { %1243 = vtanh.f32 %v506_v34 }
 0xa18   :  { %v1244_v35 = vpop.eup %1243 }
 0xa19   :  { %509 = vrot.lane.b32.xlu0 %v1244_v35, %s1347_s1 }
 0xa8b   :  { %v510_v36 = vpop.permute.xlu0 %509 }
 0xa8c   :  { %v1519_v37 = vmul.f32 %v1242_v28, %v510_v36 }
 0xa8e   :  { %516 = vrot.lane.b32.xlu1 %v1519_v37, %s1348_s7 }
 0xb00   :  { %v517_v38 = vpop.permute.xlu1 %516 }
 0xb01   :  { %1123 = vmatmul.mubr.msk.f32.vlgmr.msra.gmra.mrb[4].mxu1 %vm211_vm2, %v517_v38 }
 0xb02   :  { %1194 = vmatpush3.bf16.msra.mxu1 %v1423_v23  ;;  %1144 = vmatprep.mubr.msk.f32.mxu1 %vm1350_vm1, %v1351_v25 }
 0xb03   :  { %1195 = vmatprep.subr.bf16.mxu1 %v1349_v22 }
 0xb06   :  { %1197 = vmatpush3.bf16.msra.mxu1 %v1432_v26 }
 0xbd4   :  { %v586_v40 = vpop.f32.mrb[4].mxu1 }
 0xbd5   :  { %v590_v41 = vadd.f32 %v586_v40, %v151_v39  ;;  %v1124_v42 = vpop.f32.mrb[5].mxu1 }
 0xbd7   :  { %1245 = vtanh.f32 %v590_v41  ;;  %v1013_v44 = vmul.f32 -1.442695, %v590_v41 }
 0xbd9   :  { %1247 = vpow2.f32 %v1013_v44 }
 0xbe1   :  { %v1246_v43 = vpop.eup %1245 }
 0xbe2   :  { %600 = vrot.lane.b32.xlu0 %v1246_v43, %s1347_s1 }
 0xbe3   :  { %v1248_v45 = vpop.eup %1247 }
 0xbe4   :  { %v594_v46 = vadd.f32 1.0, %v1248_v45 }
 0xbe6   :  { %1249 = vrcp.f32 %v594_v46 }
 0xbf0   :  { %v1250_v47 = vpop.eup %1249 }
 0xbf1   :  { %v598_v51 = vmul.f32 %v1250_v47, %v506_v34  ;;  %v166_v34 = vadd.f32 %v1504_v13, %v1408_v5 }
 0xc54   :  { %v601_v48 = vpop.permute.xlu0 %600 }
 0xc55   :  { %v603_v50 = vmul.f32 %v1250_v47, %v601_v48 }
 0xc57   :  { %605 = vrot.lane.b32.xlu1 %v603_v50, %s1348_s7 }
 0xcc9   :  { %v606_v52 = vpop.permute.xlu1 %605 }
 0xcca   :  { %v608_v53 = vadd.f32 %v606_v52, %v598_v51 }
 0xccc   :  { %1251 = vtanh.f32 %v608_v53 }
 0xcd6   :  { %v1252_v54 = vpop.eup %1251 }
 0xcd7   :  { %611 = vrot.lane.b32.xlu0 %v1252_v54, %s1347_s1 }
 0xd49   :  { %v612_v55 = vpop.permute.xlu0 %611 }
 0xd4a   :  { %v614_v56 = vmul.f32 %v1250_v47, %v612_v55 }
 0xd4c   :  { %618 = vrot.lane.b32.xlu1 %v614_v56, %s1348_s7 }
 0xdbe   :  { %v1534_v57 = vpop.permute.xlu1 %618 }
 0xdbf   :  { %1134 = vmatmul.mubr.msk.f32.vlgmr.msra.gmra.mrb[10].mxu0 %vm211_vm2, %v1534_v57 }
 0xdc0   :  { %1200 = vmatpush3.bf16.msra.mxu0 %v1423_v23  ;;  %1155 = vmatprep.mubr.msk.f32.mxu0 %vm1350_vm1, %v1351_v25 }
 0xdc1   :  { %1201 = vmatprep.subr.bf16.mxu0 %v1349_v22 }
 0xdc4   :  { %1203 = vmatpush3.bf16.msra.mxu0 %v1432_v26 }
 0xe92   :  { %v688_v59 = vpop.f32.mrb[10].mxu0 }
 0xe93   :  { %v692_v60 = vadd.f32 %v688_v59, %v156_v58  ;;  %v1135_v61 = vpop.f32.mrb[11].mxu0 }
 0xe95   :  { %1253 = vtanh.f32 %v692_v60  ;;  %v1015_v63 = vmul.f32 -1.442695, %v692_v60 }
 0xe97   :  { %1255 = vpow2.f32 %v1015_v63 }
 0xe9f   :  { %v1254_v62 = vpop.eup %1253 }
 0xea0   :  { %702 = vrot.lane.b32.xlu0 %v1254_v62, %s1347_s1 }
 0xea1   :  { %v1256_v23 = vpop.eup %1255 }
 0xea2   :  { %v696_v0 = vadd.f32 1.0, %v1256_v23 }
 0xea4   :  { %1257 = vrcp.f32 %v696_v0 }
 0xeae   :  { %v1258_v25 = vpop.eup %1257 }
 0xeaf   :  { %v700_v26 = vmul.f32 %v1258_v25, %v608_v53 }
 0xf12   :  { %v703_v1 = vpop.permute.xlu0 %702 }
 0xf13   :  { %v705_v22 = vmul.f32 %v1258_v25, %v703_v1 }
 0xf15   :  { %707 = vrot.lane.b32.xlu1 %v705_v22, %s1348_s7 }
 0xf87   :  { %v708_v2 = vpop.permute.xlu1 %707 }
 0xf88   :  { %v710_v3 = vadd.f32 %v708_v2, %v700_v26 }
 0xf8a   :  { %1259 = vtanh.f32 %v710_v3 }
 0xf94   :  { %v1260_v4 = vpop.eup %1259 }
 0xf95   :  { %713 = vrot.lane.b32.xlu0 %v1260_v4, %s1347_s1 }
0x1007   :  { %v714_v6 = vpop.permute.xlu0 %713 }
0x1008   :  { %v1548_v7 = vmul.f32 %v1258_v25, %v714_v6 }
0x100a   :  { %720 = vrot.lane.b32.xlu1 %v1548_v7, %s1348_s7 }
0x107c   :  { %v721_v8 = vpop.permute.xlu1 %720 }
0x107d   :  { %1145 = vmatmul.mubr.msk.f32.vlgmr.msra.gmra.mrb[6].mxu1 %vm211_vm2, %v721_v8 }
0x1150   :  { %v790_v11 = vpop.f32.mrb[6].mxu1 }
0x1151   :  { %v794_v12 = vadd.f32 %v790_v11, %v161_v9  ;;  %v1146_v15 = vpop.f32.mrb[7].mxu1 }
0x1153   :  { %1261 = vtanh.f32 %v794_v12  ;;  %v1017_v17 = vmul.f32 -1.442695, %v794_v12 }
0x1155   :  { %1263 = vpow2.f32 %v1017_v17 }
0x115d   :  { %v1262_v16 = vpop.eup %1261 }
0x115e   :  { %804 = vrot.lane.b32.xlu0 %v1262_v16, %s1347_s1 }
0x115f   :  { %v1264_v18 = vpop.eup %1263 }
0x1160   :  { %v798_v19 = vadd.f32 1.0, %v1264_v18 }
0x1162   :  { %1265 = vrcp.f32 %v798_v19 }
0x116c   :  { %v1266_v20 = vpop.eup %1265 }
0x116d   :  { %v802_v27 = vmul.f32 %v1266_v20, %v710_v3 }
0x11d0   :  { %v805_v21 = vpop.permute.xlu0 %804 }
0x11d1   :  { %v807_v24 = vmul.f32 %v1266_v20, %v805_v21 }
0x11d3   :  { %809 = vrot.lane.b32.xlu1 %v807_v24, %s1348_s7 }
0x1245   :  { %v810_v28 = vpop.permute.xlu1 %809 }
0x1246   :  { %v812_v14 = vadd.f32 %v810_v28, %v802_v27 }
0x1248   :  { %1267 = vtanh.f32 %v812_v14 }
0x1252   :  { %v1268_v29 = vpop.eup %1267 }
0x1253   :  { %815 = vrot.lane.b32.xlu0 %v1268_v29, %s1347_s1 }
0x12c5   :  { %v816_v31 = vpop.permute.xlu0 %815 }
0x12c6   :  { %v818_v32 = vmul.f32 %v1266_v20, %v816_v31 }
0x12c8   :  { %822 = vrot.lane.b32.xlu1 %v818_v32, %s1348_s7 }
0x133a   :  { %v823_v33 = vpop.permute.xlu1 %822 }
0x133b   :  { %1156 = vmatmul.mubr.msk.f32.vlgmr.msra.gmra.mrb[12].mxu0 %vm211_vm2, %v823_v33 }
0x140e   :  { %v892_v35 = vpop.f32.mrb[12].mxu0 }
0x140f   :  { %v896_v36 = vadd.f32 %v892_v35, %v166_v34  ;;  %v1157_v38 = vpop.f32.mrb[13].mxu0 }
0x1411   :  { %1269 = vtanh.f32 %v896_v36  ;;  %v1019_v40 = vmul.f32 -1.442695, %v896_v36 }
0x1413   :  { %1271 = vpow2.f32 %v1019_v40 }
0x141b   :  { %v1270_v39 = vpop.eup %1269 }
0x141c   :  { %906 = vrot.lane.b32.xlu0 %v1270_v39, %s1347_s1 }
0x141d   :  { %v1272_v41 = vpop.eup %1271 }
0x141e   :  { %v900_v42 = vadd.f32 1.0, %v1272_v41 }
0x1420   :  { %1273 = vrcp.f32 %v900_v42 }
0x142a   :  { %v1274_v43 = vpop.eup %1273 }
0x142b   :  { %v904_v5 = vmul.f32 %v1274_v43, %v812_v14 }
0x148e   :  { %v907_v44 = vpop.permute.xlu0 %906 }
0x148f   :  { %v909_v45 = vmul.f32 %v1274_v43, %v907_v44 }
0x1491   :  { %911 = vrot.lane.b32.xlu1 %v909_v45, %s1348_s7 }
0x1495   :  { %922 = vrot.lane.b32.xlu1 %v1465_v49, %s1347_s1 }
0x1499   :  { %925 = vrot.lane.b32.xlu1 %v1498_v10, %s1352_s0 }
0x1503   :  { %v912_v13 = vpop.permute.xlu1 %911 }
0x1504   :  { %v914_v46 = vadd.f32 %v912_v13, %v904_v5 }
0x1506   :  { %1275 = vtanh.f32 %v914_v46 }
0x1507   :  { %v923_v47 = vpop.permute.xlu1 %922 }
0x1508   :  { %v935_v48 = vsel %vm211_vm2, %v1443_v30, %v923_v47 }
0x150b   :  { %v926_v50 = vpop.permute.xlu1 %925 }
0x150c   :  { %v937_v51 = vsel %vm936_vm3, %v935_v48, %v926_v50 }
0x150d   :  { %v939_v52 = vsel %vm938_vm4, %v937_v51, %v1519_v37 }
0x150e   :  { %943 = vst [vmem:[#allocation3] sm:$0xff] %v939_v52 }
0x1510   :  { %v1276_v49 = vpop.eup %1275 }
0x1511   :  { %917 = vrot.lane.b32.xlu0 %v1276_v49, %s1347_s1 }
0x1515   :  { %929 = vrot.lane.b32.xlu0 %v1548_v7, %s1347_s1 }
0x1519   :  { %932 = vrot.lane.b32.xlu0 %v818_v32, %s1352_s0 }
0x151d   :  { %951 = vrot.lane.b32.xlu0 %v914_v46, %s1352_s0 }
0x1583   :  { %v918_v10 = vpop.permute.xlu0 %917 }
0x1584   :  { %v920_v53 = vmul.f32 %v1274_v43, %v918_v10 }
0x1586   :  { %946 = vrot.lane.b32.xlu1 %v920_v53, %s1348_s7 }
0x1587   :  { %v930_v30 = vpop.permute.xlu0 %929 }
0x1588   :  { %v940_v54 = vsel %vm211_vm2, %v1534_v57, %v930_v30 }
0x158b   :  { %v933_v37 = vpop.permute.xlu0 %932 }
0x158c   :  { %v941_v55 = vsel %vm936_vm3, %v940_v54, %v933_v37 }
0x158d   :  { %v942_v56 = vsel %vm938_vm4, %v941_v55, %v920_v53 }
0x158e   :  { %944 = vst [vmem:[#allocation3 + $0x8] sm:$0xff] %v942_v56 }
0x158f   :  { %v952_v58 = vpop.permute.xlu0 %951 }
0x1590   :  { %1288 = shalt.err (!%p1285_p4)
}
0x1591   :  { %s1289_s1 = scalar_lea.hbm %s1622_s4, 256 }
0x1592   :  { %p1290_p5 = scmp.ne.s32.totalorder %s1622_s4, %s1289_s1  ;;  %p1293_p6 = scmp.lt.u32.totalorder %s1289_s1, %s1622_s4 }
0x1594   :  { %p1295_p7 = pnand %p1293_p6, %p1290_p5 }
0x1596   :  { %1298 = shalt.err (!%p1295_p7)
}
0x1597   :  { %964 = dma.vmem_to_hbm [thread:$0]  %s962_s27, 256, %s1622_s4, [#allocation4]   ;;  %954 = vst.msk [vmem:[#allocation7] sm:$0xff] %vm211_vm2, %v952_v58 }
0x1598   :  { %s1354_s12 = smov [#allocation5]   ;;  %s1355_s14 = smov [#allocation7]  }
0x1599   :  { %s971_s13 = sshll.u32 %s1354_s12, 4  ;;  %s981_s2 = sshll.u32 %s1355_s14, 4  ;;  %s972_s13 = int_to_ptr.vmem [resolvable:$true] %s971_s13  ;;  %s982_s2 = int_to_ptr.vmem [resolvable:$true] %s981_s2 }
0x159a   :  { %s1299_s15 = scalar_lea.vmem %s972_s13, 128  ;;  %p1304_p9 = scmp.lt.s32.totalorder %s972_s13, %s972_s13 }
0x159b   :  { %p1300_p8 = scmp.ne.s32.totalorder %s972_s13, %s1299_s15  ;;  %p1305_p10 = scmp.lt.s32.totalorder %s1299_s15, %s1299_s15 }
0x159d   :  { %p1306_p11 = por %p1305_p10, %p1304_p9 }
0x159f   :  { %p1307_p12 = pnand %p1306_p11, %p1300_p8 }
0x15f8   :  { %v947_v57 = vpop.permute.xlu1 %946 }
0x15f9   :  { %949 = vst.msk [vmem:[#allocation5] sm:$0xff] %vm211_vm2, %v947_v57 }
0x15fa   :  { %1310 = shalt.err (!%p1307_p12)
}
0x15fb   :  { %s1311_s17 = scalar_lea.hbm %s1623_s5, 128 }
0x15fc   :  { %p1312_p13 = scmp.ne.s32.totalorder %s1623_s5, %s1311_s17  ;;  %p1315_p0 = scmp.lt.u32.totalorder %s1311_s17, %s1623_s5 }
0x15fe   :  { %p1317_p1 = pnand %p1315_p0, %p1312_p13 }
0x1600   :  { %1320 = shalt.err (!%p1317_p1)
}
0x1601   :  { %974 = dma.vmem_to_hbm [thread:$0]  %s972_s13, 128, %s1623_s5, [#allocation6]  }
0x1602   :  { %s1321_s24 = scalar_lea.vmem %s982_s2, 128  ;;  %p1326_p3 = scmp.lt.s32.totalorder %s982_s2, %s982_s2 }
0x1603   :  { %p1322_p2 = scmp.ne.s32.totalorder %s982_s2, %s1321_s24  ;;  %p1327_p4 = scmp.lt.s32.totalorder %s1321_s24, %s1321_s24 }
0x1605   :  { %p1328_p5 = por %p1327_p4, %p1326_p3 }
0x1607   :  { %p1329_p6 = pnand %p1328_p5, %p1322_p2 }
0x1609   :  { %1332 = shalt.err (!%p1329_p6)
}
0x160a   :  { %s1333_s26 = scalar_lea.hbm %s1624_s6, 128 }
0x160b   :  { %p1334_p7 = scmp.ne.s32.totalorder %s1624_s6, %s1333_s26  ;;  %p1337_p8 = scmp.lt.u32.totalorder %s1333_s26, %s1624_s6 }
0x160d   :  { %p1339_p9 = pnand %p1337_p8, %p1334_p7 }
0x160f   :  { %1342 = shalt.err (!%p1339_p9)
}
0x1610   :  { %984 = dma.vmem_to_hbm [thread:$0]  %s982_s2, 128, %s1624_s6, [#allocation6]  }
0x1611   :  { %1343 = dma.done.wait [#allocation4], 256  }
0x1612   :  { %1344 = vsyncadd [#allocation4], 4294967040 }
0x1613   :  { %1345 = dma.done.wait [#allocation6], 256  }
0x1614   :  { %1346 = vsyncadd [#allocation6], 4294967040 }
0x1615   :  { %994 = vsyncpa [#allocation4], 1 }
0x1616   :  { %995 = vsyncpa [#allocation6], 1 }

</bundles_post_ra>
